<compile_context>
chip_gen: v6e
topology: v6e:2x2x1
jax: 0.10.0
libtpu: 0.0.40
codegen_flags: <defaults>
</compile_context>

<pallas_src>
import jax
import jax.numpy as jnp
from jax.experimental import pallas as pl
from jax.experimental.pallas import tpu as pltpu


def _round_up(x, m):
    return ((x + m - 1) // m) * m


def _cdiv(a, b):
    return (a + b - 1) // b


def _vmem_cap():
    # Generation-aware ceiling: stay well inside v7x's 64 MiB/TC while allowing
    # a bigger scoped budget on v5e/v6e (128 MiB physical).
    try:
        phys = pltpu.get_tpu_info().vmem_capacity_bytes
    except Exception:
        phys = 64 * 1024 * 1024
    return int(min(96 * 1024 * 1024, phys * 3 // 4))


# ----------------------------------------------------------------------------
# Kernel factory.
#   out(OC, ts) = relu( sum_t W_t(OC, C) @ X[phase_t, :, off_t : off_t+ts] + b )
# taps (phase, flat offset) are static Python ints; the tap loop is unrolled.
# ----------------------------------------------------------------------------
def _make_kernel(taps, oc, ts, needs_halo, out_dtype):
    def kernel(w_ref, b_ref, xc_ref, *rest):
        if needs_halo:
            xn_ref, o_ref = rest
            # current tile + narrow halo block -> (PH, C, ts + hw)
            window = jnp.concatenate([xc_ref[...], xn_ref[...]], axis=-1)
        else:
            (o_ref,) = rest
            window = xc_ref[...]                      # (PH, C, ts)

        acc = jnp.zeros((oc, ts), jnp.float32)
        for t, (phase, off) in enumerate(taps):       # static, unrolled (<= KH*KW)
            slab = window[phase, :, off:off + ts]     # (C, ts), static offsets only
            acc = acc + jnp.dot(w_ref[t], slab,
                                preferred_element_type=jnp.float32)

        o_ref[...] = jnp.maximum(acc + b_ref[...], 0.0).astype(out_dtype)

    return kernel


# ----------------------------------------------------------------------------
# Wrapper: BN folding, (polyphase) flattening, tiling, pallas_call.
# ----------------------------------------------------------------------------
def basic_conv2d(x, w, gamma, beta, running_mean, running_var,
                 *, stride=(1, 1), padding=(0, 0), eps=1e-3,
                 out_dtype=jnp.bfloat16):
    N, C, H, W = x.shape
    OC, IC, KH, KW = w.shape
    assert C == IC
    sh, sw = stride
    pad_h, pad_w = padding

    # ---- fold eval-mode BatchNorm into the conv ------------------------------
    scale = gamma * jax.lax.rsqrt(running_var + eps)
    bias = beta - running_mean * scale

    # ---- geometry ------------------------------------------------------------
    Hp, Wp = H + 2 * pad_h, W + 2 * pad_w
    OH = (Hp - KH) // sh + 1
    OW = (Wp - KW) // sw + 1
    PH = sh * sw                       # stride phases (1 for stride 1)
    Hph = _cdiv(Hp, sh)
    Wph = _cdiv(Wp, sw)

    # Tap table: tap (kh,kw) reads phase (kh%sh, kw%sw) at a constant flat
    # offset (kh//sh)*Wph + kw//sw relative to the output's flat position
    # (row-major with row stride Wph) -> every tap is a static lane shift.
    taps = tuple(((kh % sh) * sw + (kw % sw), (kh // sh) * Wph + (kw // sw))
                 for kh in range(KH) for kw in range(KW))
    halo = max(off for _, off in taps)

    # ---- tile selection (lane-dense, >=2 parallel grid tiles) ----------------
    P_valid = OH * Wph                              # flat output span we keep
    hw = _round_up(halo, 128) if halo > 0 else 0    # narrow halo block width
    if N >= 2:
        ts = _round_up(P_valid, 128)                # batch axis already parallel
    else:
        ts = _round_up(_cdiv(P_valid, 2), 128)      # ensure >=2 spatial tiles
    ts = min(ts, 2048)
    if hw:
        ts = _round_up(max(ts, hw), hw)             # halo block must divide ts
    S = _cdiv(P_valid, ts)
    L = S * ts + hw                                 # padded flat input length

    # ---- input prep: pad once; polyphase split only for stride > 1 -----------
    xp = jnp.pad(x, ((0, 0), (0, 0), (pad_h, pad_h), (pad_w, pad_w)))
    if PH == 1:
        planes = xp[:, None]                                       # (N,1,C,Hp,Wp)
    else:
        # stride-s conv == sum of stride-1 convs on its phase planes (no dup).
        plist = []
        for p in range(sh):
            for q in range(sw):
                pp = xp[:, :, p::sh, q::sw]
                pp = jnp.pad(pp, ((0, 0), (0, 0),
                                  (0, Hph - pp.shape[2]),
                                  (0, Wph - pp.shape[3])))
                plist.append(pp)
        planes = jnp.stack(plist, axis=1)                          # (N,PH,C,Hph,Wph)
    xf = planes.reshape(N, PH, C, Hph * Wph)
    if L > Hph * Wph:
        xf = jnp.pad(xf, ((0, 0), (0, 0), (0, 0), (0, L - Hph * Wph)))
    else:
        xf = xf[..., :L]                      # never-read tail (proved in design)
    xf = xf.astype(jnp.bfloat16)

    # ---- BN-folded weights / bias (tiny, fully VMEM-resident) ----------------
    T = KH * KW
    w_taps = (w * scale[:, None, None, None]).transpose(2, 3, 0, 1)
    w_taps = w_taps.reshape(T, OC, C).astype(jnp.bfloat16)
    b_col = bias.reshape(OC, 1).astype(jnp.float32)

    needs_halo = hw > 0
    kernel = _make_kernel(taps, OC, ts, needs_halo, out_dtype)

    in_specs = [
        pl.BlockSpec((T, OC, C), lambda n, s: (0, 0, 0)),          # resident weights
        pl.BlockSpec((OC, 1), lambda n, s: (0, 0)),                # resident bias
        pl.BlockSpec((None, PH, C, ts), lambda n, s: (n, 0, 0, s)),   # current tile
    ]
    args = [w_taps, b_col, xf]
    if needs_halo:
        blk = ts // hw
        in_specs.append(                                           # narrow halo
            pl.BlockSpec((None, PH, C, hw), lambda n, s: (n, 0, 0, (s + 1) * blk)))
        args.append(xf)

    vmem_need = (
        2 * w_taps.size * 2 + 2 * b_col.size * 4
        + 4 * PH * C * (ts + hw) * 2          # x tiles (double-buffered) + window
        + 2 * OC * ts * 2                     # output double buffer
        + OC * ts * 4 + 2 * C * ts * 2        # f32 accumulator + tap slab temps
        + (4 << 20)
    )
    vmem_limit = int(min(max(vmem_need, 32 << 20), _vmem_cap()))

    out = pl.pallas_call(
        kernel,
        out_shape=jax.ShapeDtypeStruct((N, OC, S * ts), out_dtype),
        grid=(N, S),
        in_specs=in_specs,
        out_specs=pl.BlockSpec((None, OC, ts), lambda n, s: (n, 0, s)),
        compiler_params=pltpu.CompilerParams(
            dimension_semantics=("parallel", "parallel"),
            vmem_limit_bytes=vmem_limit,
        ),
    )(*args)

    # Flat (row stride Wph) -> NCHW: slice only, no transpose.
    # TODO(synk): the halo block re-reads hw/ts of the input per tile and this
    # final width slice is one extra (cheap) XLA pass; writing (N,OC,OH,OW)
    # directly would need element-level output indexing in the BlockSpec.
    return out[:, :, :OH * Wph].reshape(N, OC, OH, Wph)[:, :, :, :OW]


# ----------------------------------------------------------------------------
# Reference (same bf16 operand quantization, f32 accumulation) for checking.
# ----------------------------------------------------------------------------
def reference_basic_conv2d(x, w, gamma, beta, mean, var, *, stride, padding,
                           eps=1e-3):
    scale = gamma / jnp.sqrt(var + eps)
    bias = beta - mean * scale
    w_s = (w * scale[:, None, None, None]).astype(jnp.bfloat16)
    xb = x.astype(jnp.bfloat16)
    y = jax.lax.conv_general_dilated(
        xb, w_s, window_strides=stride,
        padding=[(padding[0], padding[0]), (padding[1], padding[1])],
        dimension_numbers=("NCHW", "OIHW", "NCHW"),
        preferred_element_type=jnp.float32)
    y = y + bias[None, :, None, None]
    return jnp.maximum(y, 0.0)


if __name__ == "__main__":
    key = jax.random.PRNGKey(0)

    def make_params(k, oc, ic, kh, kw):
        k1, k2, k3, k4, k5 = jax.random.split(k, 5)
        w = 0.1 * jax.random.truncated_normal(k1, -2.0, 2.0,
                                              (oc, ic, kh, kw), jnp.float32)
        gamma = 1.0 + 0.1 * jax.random.normal(k2, (oc,), jnp.float32)
        beta = 0.1 * jax.random.normal(k3, (oc,), jnp.float32)
        mean = 0.1 * jax.random.normal(k4, (oc,), jnp.float32)
        var = 1.0 + 0.5 * jax.random.uniform(k5, (oc,), jnp.float32)
        return w, gamma, beta, mean, var

    fwd = jax.jit(basic_conv2d,
                  static_argnames=("stride", "padding", "eps", "out_dtype"))

    # (N, C, H, W, OC, KH, KW, stride, padding)
    cases = [
        (2, 4, 16, 16, 32, 3, 3, (1, 1), (1, 1)),     # primary small case
        (2, 128, 12, 12, 32, 3, 3, (1, 1), (1, 1)),   # larger C reduction
        (2, 16, 17, 17, 24, 3, 3, (2, 2), (0, 0)),    # strided (polyphase path)
    ]
    for idx, (n, c, h, wd, oc, kh, kw, st, pd) in enumerate(cases):
        pkey, xkey = jax.random.split(jax.random.fold_in(key, idx))
        w, gamma, beta, mean, var = make_params(pkey, oc, c, kh, kw)
        x = jax.random.normal(xkey, (n, c, h, wd), dtype=jnp.float32)

        out = jax.block_until_ready(
            fwd(x, w, gamma, beta, mean, var, stride=st, padding=pd))
        ref = reference_basic_conv2d(x, w, gamma, beta, mean, var,
                                     stride=st, padding=pd)

        oh = (h + 2 * pd[0] - kh) // st[0] + 1
        ow = (wd + 2 * pd[1] - kw) // st[1] + 1
        out32 = out.astype(jnp.float32)
        assert out.shape == (n, oc, oh, ow), out.shape
        assert bool(jnp.all(jnp.isfinite(out32)))
        assert bool(jnp.allclose(out32, ref, rtol=2e-2, atol=2e-2)), \
            float(jnp.max(jnp.abs(out32 - ref)))

    print("KERNEL_OK")
</pallas_src>

<mosaic_0001>
module attributes {stable_mosaic.version = 11 : i64} {
  func.func @kernel(%arg0: i32, %arg1: i32, %arg2: memref<9x32x4xbf16, #tpu.memory_space<vmem>>, %arg3: memref<32x1xf32, #tpu.memory_space<vmem>>, %arg4: memref<1x1x4x384xbf16, #tpu.memory_space<vmem>>, %arg5: memref<1x1x4x128xbf16, #tpu.memory_space<vmem>>, %arg6: memref<1x32x384xbf16, #tpu.memory_space<vmem>>) attributes {dimension_semantics = [#tpu.dimension_semantics<parallel>, #tpu.dimension_semantics<parallel>], iteration_bounds = array<i64: 2, 1>, scalar_prefetch = 0 : i64, scratch_operands = 0 : i64, tpu.core_type = #tpu.core_type<tc>, window_params = [{pipeline_mode = #tpu.pipeline_mode<synchronous>, transform_indices = @transform_0, window_bounds = array<i64: 9, 32, 4>}, {pipeline_mode = #tpu.pipeline_mode<synchronous>, transform_indices = @transform_1, window_bounds = array<i64: 32, 1>}, {transform_indices = @transform_2, window_bounds = array<i64: 1, 1, 4, 384>}, {transform_indices = @transform_3, window_bounds = array<i64: 1, 1, 4, 128>}, {transform_indices = @transform_4, window_bounds = array<i64: 1, 32, 384>}]} {
    %c0 = arith.constant 0 : index
    %c0_0 = arith.constant 0 : index
    %c0_1 = arith.constant 0 : index
    %c0_2 = arith.constant 0 : index
    %0 = vector.load %arg4[%c0, %c0_0, %c0_1, %c0_2] : memref<1x1x4x384xbf16, #tpu.memory_space<vmem>>, vector<1x1x4x384xbf16>
    %1 = vector.shape_cast %0 : vector<1x1x4x384xbf16> to vector<1x4x384xbf16>
    %c0_3 = arith.constant 0 : index
    %c0_4 = arith.constant 0 : index
    %c0_5 = arith.constant 0 : index
    %c0_6 = arith.constant 0 : index
    %2 = vector.load %arg5[%c0_3, %c0_4, %c0_5, %c0_6] : memref<1x1x4x128xbf16, #tpu.memory_space<vmem>>, vector<1x1x4x128xbf16>
    %3 = vector.shape_cast %2 : vector<1x1x4x128xbf16> to vector<1x4x128xbf16>
    %4 = tpu.concatenate %1, %3 in 2 : vector<1x4x384xbf16>, vector<1x4x128xbf16> -> vector<1x4x512xbf16>
    %cst = arith.constant 0.000000e+00 : f32
    %5 = vector.broadcast %cst : f32 to vector<32x384xf32>
    %6 = vector.extract_strided_slice %4 {offsets = [0, 0, 0], sizes = [1, 4, 384], strides = [1, 1, 1]} : vector<1x4x512xbf16> to vector<1x4x384xbf16>
    %7 = vector.shape_cast %6 : vector<1x4x384xbf16> to vector<4x384xbf16>
    %c0_7 = arith.constant 0 : index
    %c0_8 = arith.constant 0 : index
    %c0_9 = arith.constant 0 : index
    %8 = vector.load %arg2[%c0_7, %c0_8, %c0_9] : memref<9x32x4xbf16, #tpu.memory_space<vmem>>, vector<1x32x4xbf16>
    %9 = vector.shape_cast %8 : vector<1x32x4xbf16> to vector<32x4xbf16>
    %cst_10 = arith.constant dense<0.000000e+00> : vector<32x384xf32>
    %10 = tpu.matmul %9, %7, %cst_10 {dimension_numbers = #tpu.dot_dimension_numbers<[1], [0], [0], [1], [0, 0, 1, 1], [], []>} : vector<32x4xbf16>, vector<4x384xbf16>, vector<32x384xf32> -> vector<32x384xf32>
    %11 = arith.addf %5, %10 : vector<32x384xf32>
    %12 = vector.extract_strided_slice %4 {offsets = [0, 0, 1], sizes = [1, 4, 384], strides = [1, 1, 1]} : vector<1x4x512xbf16> to vector<1x4x384xbf16>
    %13 = vector.shape_cast %12 : vector<1x4x384xbf16> to vector<4x384xbf16>
    %c1 = arith.constant 1 : index
    %c0_11 = arith.constant 0 : index
    %c0_12 = arith.constant 0 : index
    %14 = vector.load %arg2[%c1, %c0_11, %c0_12] : memref<9x32x4xbf16, #tpu.memory_space<vmem>>, vector<1x32x4xbf16>
    %15 = vector.shape_cast %14 : vector<1x32x4xbf16> to vector<32x4xbf16>
    %cst_13 = arith.constant dense<0.000000e+00> : vector<32x384xf32>
    %16 = tpu.matmul %15, %13, %cst_13 {dimension_numbers = #tpu.dot_dimension_numbers<[1], [0], [0], [1], [0, 0, 1, 1], [], []>} : vector<32x4xbf16>, vector<4x384xbf16>, vector<32x384xf32> -> vector<32x384xf32>
    %17 = arith.addf %11, %16 : vector<32x384xf32>
    %18 = vector.extract_strided_slice %4 {offsets = [0, 0, 2], sizes = [1, 4, 384], strides = [1, 1, 1]} : vector<1x4x512xbf16> to vector<1x4x384xbf16>
    %19 = vector.shape_cast %18 : vector<1x4x384xbf16> to vector<4x384xbf16>
    %c2 = arith.constant 2 : index
    %c0_14 = arith.constant 0 : index
    %c0_15 = arith.constant 0 : index
    %20 = vector.load %arg2[%c2, %c0_14, %c0_15] : memref<9x32x4xbf16, #tpu.memory_space<vmem>>, vector<1x32x4xbf16>
    %21 = vector.shape_cast %20 : vector<1x32x4xbf16> to vector<32x4xbf16>
    %cst_16 = arith.constant dense<0.000000e+00> : vector<32x384xf32>
    %22 = tpu.matmul %21, %19, %cst_16 {dimension_numbers = #tpu.dot_dimension_numbers<[1], [0], [0], [1], [0, 0, 1, 1], [], []>} : vector<32x4xbf16>, vector<4x384xbf16>, vector<32x384xf32> -> vector<32x384xf32>
    %23 = arith.addf %17, %22 : vector<32x384xf32>
    %24 = vector.extract_strided_slice %4 {offsets = [0, 0, 18], sizes = [1, 4, 384], strides = [1, 1, 1]} : vector<1x4x512xbf16> to vector<1x4x384xbf16>
    %25 = vector.shape_cast %24 : vector<1x4x384xbf16> to vector<4x384xbf16>
    %c3 = arith.constant 3 : index
    %c0_17 = arith.constant 0 : index
    %c0_18 = arith.constant 0 : index
    %26 = vector.load %arg2[%c3, %c0_17, %c0_18] : memref<9x32x4xbf16, #tpu.memory_space<vmem>>, vector<1x32x4xbf16>
    %27 = vector.shape_cast %26 : vector<1x32x4xbf16> to vector<32x4xbf16>
    %cst_19 = arith.constant dense<0.000000e+00> : vector<32x384xf32>
    %28 = tpu.matmul %27, %25, %cst_19 {dimension_numbers = #tpu.dot_dimension_numbers<[1], [0], [0], [1], [0, 0, 1, 1], [], []>} : vector<32x4xbf16>, vector<4x384xbf16>, vector<32x384xf32> -> vector<32x384xf32>
    %29 = arith.addf %23, %28 : vector<32x384xf32>
    %30 = vector.extract_strided_slice %4 {offsets = [0, 0, 19], sizes = [1, 4, 384], strides = [1, 1, 1]} : vector<1x4x512xbf16> to vector<1x4x384xbf16>
    %31 = vector.shape_cast %30 : vector<1x4x384xbf16> to vector<4x384xbf16>
    %c4 = arith.constant 4 : index
    %c0_20 = arith.constant 0 : index
    %c0_21 = arith.constant 0 : index
    %32 = vector.load %arg2[%c4, %c0_20, %c0_21] : memref<9x32x4xbf16, #tpu.memory_space<vmem>>, vector<1x32x4xbf16>
    %33 = vector.shape_cast %32 : vector<1x32x4xbf16> to vector<32x4xbf16>
    %cst_22 = arith.constant dense<0.000000e+00> : vector<32x384xf32>
    %34 = tpu.matmul %33, %31, %cst_22 {dimension_numbers = #tpu.dot_dimension_numbers<[1], [0], [0], [1], [0, 0, 1, 1], [], []>} : vector<32x4xbf16>, vector<4x384xbf16>, vector<32x384xf32> -> vector<32x384xf32>
    %35 = arith.addf %29, %34 : vector<32x384xf32>
    %36 = vector.extract_strided_slice %4 {offsets = [0, 0, 20], sizes = [1, 4, 384], strides = [1, 1, 1]} : vector<1x4x512xbf16> to vector<1x4x384xbf16>
    %37 = vector.shape_cast %36 : vector<1x4x384xbf16> to vector<4x384xbf16>
    %c5 = arith.constant 5 : index
    %c0_23 = arith.constant 0 : index
    %c0_24 = arith.constant 0 : index
    %38 = vector.load %arg2[%c5, %c0_23, %c0_24] : memref<9x32x4xbf16, #tpu.memory_space<vmem>>, vector<1x32x4xbf16>
    %39 = vector.shape_cast %38 : vector<1x32x4xbf16> to vector<32x4xbf16>
    %cst_25 = arith.constant dense<0.000000e+00> : vector<32x384xf32>
    %40 = tpu.matmul %39, %37, %cst_25 {dimension_numbers = #tpu.dot_dimension_numbers<[1], [0], [0], [1], [0, 0, 1, 1], [], []>} : vector<32x4xbf16>, vector<4x384xbf16>, vector<32x384xf32> -> vector<32x384xf32>
    %41 = arith.addf %35, %40 : vector<32x384xf32>
    %42 = vector.extract_strided_slice %4 {offsets = [0, 0, 36], sizes = [1, 4, 384], strides = [1, 1, 1]} : vector<1x4x512xbf16> to vector<1x4x384xbf16>
    %43 = vector.shape_cast %42 : vector<1x4x384xbf16> to vector<4x384xbf16>
    %c6 = arith.constant 6 : index
    %c0_26 = arith.constant 0 : index
    %c0_27 = arith.constant 0 : index
    %44 = vector.load %arg2[%c6, %c0_26, %c0_27] : memref<9x32x4xbf16, #tpu.memory_space<vmem>>, vector<1x32x4xbf16>
    %45 = vector.shape_cast %44 : vector<1x32x4xbf16> to vector<32x4xbf16>
    %cst_28 = arith.constant dense<0.000000e+00> : vector<32x384xf32>
    %46 = tpu.matmul %45, %43, %cst_28 {dimension_numbers = #tpu.dot_dimension_numbers<[1], [0], [0], [1], [0, 0, 1, 1], [], []>} : vector<32x4xbf16>, vector<4x384xbf16>, vector<32x384xf32> -> vector<32x384xf32>
    %47 = arith.addf %41, %46 : vector<32x384xf32>
    %48 = vector.extract_strided_slice %4 {offsets = [0, 0, 37], sizes = [1, 4, 384], strides = [1, 1, 1]} : vector<1x4x512xbf16> to vector<1x4x384xbf16>
    %49 = vector.shape_cast %48 : vector<1x4x384xbf16> to vector<4x384xbf16>
    %c7 = arith.constant 7 : index
    %c0_29 = arith.constant 0 : index
    %c0_30 = arith.constant 0 : index
    %50 = vector.load %arg2[%c7, %c0_29, %c0_30] : memref<9x32x4xbf16, #tpu.memory_space<vmem>>, vector<1x32x4xbf16>
    %51 = vector.shape_cast %50 : vector<1x32x4xbf16> to vector<32x4xbf16>
    %cst_31 = arith.constant dense<0.000000e+00> : vector<32x384xf32>
    %52 = tpu.matmul %51, %49, %cst_31 {dimension_numbers = #tpu.dot_dimension_numbers<[1], [0], [0], [1], [0, 0, 1, 1], [], []>} : vector<32x4xbf16>, vector<4x384xbf16>, vector<32x384xf32> -> vector<32x384xf32>
    %53 = arith.addf %47, %52 : vector<32x384xf32>
    %54 = vector.extract_strided_slice %4 {offsets = [0, 0, 38], sizes = [1, 4, 384], strides = [1, 1, 1]} : vector<1x4x512xbf16> to vector<1x4x384xbf16>
    %55 = vector.shape_cast %54 : vector<1x4x384xbf16> to vector<4x384xbf16>
    %c8 = arith.constant 8 : index
    %c0_32 = arith.constant 0 : index
    %c0_33 = arith.constant 0 : index
    %56 = vector.load %arg2[%c8, %c0_32, %c0_33] : memref<9x32x4xbf16, #tpu.memory_space<vmem>>, vector<1x32x4xbf16>
    %57 = vector.shape_cast %56 : vector<1x32x4xbf16> to vector<32x4xbf16>
    %cst_34 = arith.constant dense<0.000000e+00> : vector<32x384xf32>
    %58 = tpu.matmul %57, %55, %cst_34 {dimension_numbers = #tpu.dot_dimension_numbers<[1], [0], [0], [1], [0, 0, 1, 1], [], []>} : vector<32x4xbf16>, vector<4x384xbf16>, vector<32x384xf32> -> vector<32x384xf32>
    %59 = arith.addf %53, %58 : vector<32x384xf32>
    %c0_35 = arith.constant 0 : index
    %c0_36 = arith.constant 0 : index
    %60 = vector.load %arg3[%c0_35, %c0_36] : memref<32x1xf32, #tpu.memory_space<vmem>>, vector<32x1xf32>
    %61 = vector.broadcast %60 : vector<32x1xf32> to vector<32x384xf32>
    %62 = arith.addf %59, %61 : vector<32x384xf32>
    %cst_37 = arith.constant 0.000000e+00 : f32
    %63 = vector.broadcast %cst_37 : f32 to vector<32x384xf32>
    %64 = arith.maximumf %62, %63 : vector<32x384xf32>
    %65 = arith.truncf %64 : vector<32x384xf32> to vector<32x384xbf16>
    %c0_38 = arith.constant 0 : index
    %c0_39 = arith.constant 0 : index
    %c0_40 = arith.constant 0 : index
    %66 = vector.load %arg6[%c0_38, %c0_39, %c0_40] : memref<1x32x384xbf16, #tpu.memory_space<vmem>>, vector<1x32x384xbf16>
    %67 = vector.shape_cast %66 : vector<1x32x384xbf16> to vector<32x384xbf16>
    %68 = vector.shape_cast %65 : vector<32x384xbf16> to vector<1x32x384xbf16>
    tpu.vector_store %arg6[%c0_38, %c0_39, %c0_40], %68 {strides = array<i32>} : memref<1x32x384xbf16, #tpu.memory_space<vmem>>, vector<1x32x384xbf16>,
    return
  }
  func.func @transform_0(%arg0: i32, %arg1: i32) -> (i32, i32, i32) {
    %c0_i32 = arith.constant 0 : i32
    %c0_i32_0 = arith.constant 0 : i32
    %c0_i32_1 = arith.constant 0 : i32
    %c0_i32_2 = arith.constant 0 : i32
    return %c0_i32, %c0_i32_0, %c0_i32_1 : i32, i32, i32
  }
  func.func @transform_1(%arg0: i32, %arg1: i32) -> (i32, i32) {
    %c0_i32 = arith.constant 0 : i32
    %c0_i32_0 = arith.constant 0 : i32
    %c0_i32_1 = arith.constant 0 : i32
    return %c0_i32, %c0_i32_0 : i32, i32
  }
  func.func @transform_2(%arg0: i32, %arg1: i32) -> (i32, i32, i32, i32) {
    %c0_i32 = arith.constant 0 : i32
    %c0_i32_0 = arith.constant 0 : i32
    %c0_i32_1 = arith.constant 0 : i32
    return %arg0, %c0_i32, %c0_i32_0, %arg1 : i32, i32, i32, i32
  }
  func.func @transform_3(%arg0: i32, %arg1: i32) -> (i32, i32, i32, i32) {
    %c1_i32 = arith.constant 1 : i32
    %0 = arith.addi %arg1, %c1_i32 : i32
    %c3_i32 = arith.constant 3 : i32
    %1 = arith.muli %0, %c3_i32 : i32
    %c0_i32 = arith.constant 0 : i32
    %c0_i32_0 = arith.constant 0 : i32
    %c0_i32_1 = arith.constant 0 : i32
    return %arg0, %c0_i32, %c0_i32_0, %1 : i32, i32, i32, i32
  }
  func.func @transform_4(%arg0: i32, %arg1: i32) -> (i32, i32, i32) {
    %c0_i32 = arith.constant 0 : i32
    %c0_i32_0 = arith.constant 0 : i32
    return %arg0, %c0_i32, %arg1 : i32, i32, i32
  }
}

</mosaic_0001>

<bundles_post_ra>
// kernel: basic_conv2d.1
= control target key start
LH: loop header
LB: loop body
LE: loop exit
PB: predicated region body
PF: predicated region fallthrough
CT: control target
= control target key end

     0   :  { %s2225_s15 = smov 0   ;;  %s2227_s16 = smov 0   ;;  %s2685_s0 = inlined_call_operand.vmem [shape: bf16[9,32,4], index: 0, kind: input, shape index: {}]   ;;  %s2686_s1 = inlined_call_operand.vmem [shape: f32[32,1], index: 1, kind: input, shape index: {}]   ;;  %s2687_s2 = inlined_call_operand.vmem [shape: bf16[2,1,4,512], index: 2, kind: input, shape index: {}, may-alias: {2,3}]   ;;  %s2688_s3 = inlined_call_operand.vmem [shape: bf16[2,1,4,512], index: 3, kind: input, shape index: {}, may-alias: {2,3}]   ;;  %s2689_s4 = inlined_call_operand.vmem [shape: bf16[2,32,384], index: 4, kind: output, shape index: {}]  }
   0x1   :  { %s2229_s17 = smov 0  }
   0x2 LB: > { %s26_s18 = sadd.s32 1, %s2184_s16  ;;  %p1897_p0 = scmp.ge.s32.totalorder %s2188_s17, 1  ;;  %s2188_s17 = sphi %s2229_s17, %s14_s17   ;;  %s2184_s16 = sphi %s2227_s16, %s2725_s16   ;;  %s2180_s15 = sphi %s2225_s15, %s2724_s15  }
   0x3   : > { %p28_p1 = scmp.ge.s32.totalorder %s26_s18, 2  ;;  %p214_p2 = scmp.lt.s32.totalorder %s2188_s17, 3 }
   0x5   : > { %s2727_s18 = smov (%p28_p1, %s26_s18), 0  ;;  %p215_p3 = pnand %p1897_p0, %p214_p2 }
   0x7   : > { %218 = sbr.rel (%p215_p3) target bundleno = 457 (0x1c9), region = 36 }
   0xc   : > { %p267_p4 = scmp.lt.s32.totalorder %s2180_s15, 1  ;;  %v310_v0 = vlaneseq  ;;  %v2190_v1 = vmov 1983009808   ;;  %v2248_v5 = vld [vmem:[%s2685_s0 + $0x10] sm:$0xff]   ;;  %v2191_v6 = vmov 0   ;;  %vm354_vm0 = vcmask 31744  }
   0xd   : > { %v308_v2 = vunpack.c.l.s4 %v2190_v1  ;;  %403 = vmatprep.mubr.bf16.mxu0 %v2191_v6  ;;  %2146 = vset.pattern.permute.xlu1 %v2191_v6  ;;  %s2192_s29 = smov 127   ;;  %s2193_s30 = smov 126   ;;  %v1693_v14 = vld [vmem:[%s2686_s1 + $0x8] sm:$0xff]  ;;  %v1692_v15 = vld [vmem:[%s2686_s1] sm:$0xff]  ;;  %v1694_v16 = vld [vmem:[%s2686_s1 + $0x10] sm:$0xff]  ;;  %vm350_vm1 = vcmask 1039360  }
   0xe   : > { %s2729_s15 = smov (!%p267_p4, %s2180_s15), 1  ;;  %v311_v3 = vshrl.u32 %v310_v0, 7  ;;  %2049 = vmatprep.mubr.msk.bf16.mxu1 %vm354_vm0, %v2248_v5  ;;  %2145 = vset.pattern.permute.xlu0 %v2191_v6  ;;  %s2194_s5 = smov 110   ;;  %v1695_v17 = vld [vmem:[%s2686_s1 + $0x18] sm:$0xff]  ;;  %vm361_vm2 = vcmask 1041408   ;;  %vm623_vm3 = vcmask 1031168  }
   0xf   : > { %v309_v4 = vunpack.c.0.s8 %v308_v2  ;;  %s2008_s21 = sshll.u32 %s2729_s15, 3  ;;  %s2195_s6 = smov 109   ;;  %v2149_v28 = vld [vmem:[%s2685_s0 + $0x18] sm:$0xff]   ;;  %v2150_v36 = vld [vmem:[%s2685_s0] sm:$0xff]   ;;  %vm779_vm4 = vcmask 900096   ;;  %v2151_v43 = vld [vmem:[%s2685_s0 + $0x8] sm:$0xff]  }
  0x10   : > { %s274_s24 = scalar_lea.vmem %s2687_s2, %s2008_s21  ;;  %s2010_s25 = sadd.s32 6, %s2008_s21  ;;  %v2152_v48 = vld [vmem:[%s2685_s0 + $0x20] sm:$0xff]   ;;  %vm935_vm5 = vcmask 891904   ;;  %v2153_v53 = vld [vmem:[%s2685_s0 + $0x28] sm:$0xff]   ;;  %v2154_v59 = vld [vmem:[%s2685_s0 + $0x30] sm:$0xff]   ;;  %vm1091_vm6 = vcmask 883712  }
  0x11   : > { %v312_v7 = vsub.s32 %v309_v4, %v311_v3  ;;  %v303_v8 = vld [vmem:[%s274_s24] sm:$0x3f]  ;;  %s289_s28 = scalar_lea.vmem %s2688_s3, %s2010_s25  ;;  %s2196_s7 = smov 108   ;;  %v2155_v2 = vld [vmem:[%s2685_s0 + $0x38] sm:$0xff]   ;;  %vm1247_vm7 = vcmask 752640   ;;  %vm1403_vm8 = vcmask 744448  }
  0x12   : > { %v306_v10 = vcombine.high %v303_v8, %v303_v8  ;;  %v304_v13 = vld [vmem:[%s289_s28] sm:$0x3]  ;;  %s2197_s8 = smov 92   ;;  %s2198_s9 = smov 91   ;;  %vm1559_vm9 = vcmask 736256  }
  0x13   : > { %v2259_v9 = vrot.slane %v303_v8, %v312_v7  ;;  %s2199_s10 = smov 90  }
  0x14   : > { %v2265_v11 = vrot.slane %v306_v10, %v312_v7  ;;  %v2156_v7 = vld [vmem:[%s2685_s0 + $0x40] sm:$0xff]  }
  0x15   : > { %342 = vrot.lane.b32.xlu0 %v2259_v9, %s2192_s29  ;;  %v2269_v12 = vcombine.high %v2259_v9, %v2259_v9  ;;  %v490_v30 = vsel %vm361_vm2, %v2259_v9, 0 }
  0x16   : > { %346 = vrot.lane.b32.xlu1 %v2265_v11, %s2192_s29  ;;  %v496_v27 = vsel %vm361_vm2, %v2265_v11, 0 }
  0x19   : > { %344 = vrot.lane.b32.xlu0 %v2269_v12, %s2192_s29 }
  0x1a   : > { %348 = vrot.lane.b32.xlu1 %v304_v13, %s2192_s29 }
  0x1d   : > { %615 = vrot.lane.b32.xlu0 %v2259_v9, %s2193_s30 }
  0x1e   : > { %617 = vrot.lane.b32.xlu1 %v2269_v12, %s2193_s30 }
  0x21   : > { %619 = vrot.lane.b32.xlu0 %v2265_v11, %s2193_s30 }
  0x22   : > { %621 = vrot.lane.b32.xlu1 %v304_v13, %s2193_s30 }
  0x25   : > { %771 = vrot.lane.b32.xlu0 %v2259_v9, %s2194_s5 }
  0x26   : > { %773 = vrot.lane.b32.xlu1 %v2269_v12, %s2194_s5 }
  0x29   : > { %775 = vrot.lane.b32.xlu0 %v2265_v11, %s2194_s5 }
  0x2a   : > { %777 = vrot.lane.b32.xlu1 %v304_v13, %s2194_s5 }
  0x2d   : > { %927 = vrot.lane.b32.xlu0 %v2259_v9, %s2195_s6 }
  0x2e   : > { %929 = vrot.lane.b32.xlu1 %v2269_v12, %s2195_s6 }
  0x31   : > { %931 = vrot.lane.b32.xlu0 %v2265_v11, %s2195_s6 }
  0x32   : > { %933 = vrot.lane.b32.xlu1 %v304_v13, %s2195_s6 }
  0x35   : > { %1083 = vrot.lane.b32.xlu0 %v2259_v9, %s2196_s7 }
  0x36   : > { %1085 = vrot.lane.b32.xlu1 %v2269_v12, %s2196_s7 }
  0x39   : > { %1087 = vrot.lane.b32.xlu0 %v2265_v11, %s2196_s7 }
  0x3a   : > { %1089 = vrot.lane.b32.xlu1 %v304_v13, %s2196_s7 }
  0x3d   : > { %1239 = vrot.lane.b32.xlu0 %v2259_v9, %s2197_s8 }
  0x3e   : > { %1241 = vrot.lane.b32.xlu1 %v2269_v12, %s2197_s8 }
  0x41   : > { %1243 = vrot.lane.b32.xlu0 %v2265_v11, %s2197_s8 }
  0x42   : > { %1245 = vrot.lane.b32.xlu1 %v304_v13, %s2197_s8 }
  0x45   : > { %1395 = vrot.lane.b32.xlu0 %v2259_v9, %s2198_s9 }
  0x46   : > { %1397 = vrot.lane.b32.xlu1 %v2269_v12, %s2198_s9 }
  0x49   : > { %1399 = vrot.lane.b32.xlu0 %v2265_v11, %s2198_s9 }
  0x4a   : > { %1401 = vrot.lane.b32.xlu1 %v304_v13, %s2198_s9  ;;  %s2110_s9 = smul.u32 48, %s2729_s15 }
  0x4c   : > { %s2662_s11 = scalar_lea.vmem %s2689_s4, %s2110_s9 }
  0x4d   : > { %1551 = vrot.lane.b32.xlu0 %v2259_v9, %s2199_s10 }
  0x4e   : > { %1553 = vrot.lane.b32.xlu1 %v2269_v12, %s2199_s10 }
  0x51   : > { %1555 = vrot.lane.b32.xlu0 %v2265_v11, %s2199_s10 }
  0x52   : > { %1557 = vrot.lane.b32.xlu1 %v304_v13, %s2199_s10 }
  0x55   : > { %1698 = vperm.xlu0 %2145, %v1692_v15  }
  0x56   : > { %1703 = vperm.xlu1 %2146, %v1693_v14  }
  0x59   : > { %1713 = vperm.xlu0 %2145, %v1695_v17  }
  0x5a   : > { %1708 = vperm.xlu1 %2146, %v1694_v16  }
  0x87   : > { %v343_v18 = vpop.permute.xlu0 %342 }
  0x88   : > { %v347_v19 = vpop.permute.xlu1 %346 }
  0x8b   : > { %v345_v20 = vpop.permute.xlu0 %344 }
  0x8c   : > { %v352_v21 = vsel %vm350_vm1, %v345_v20, %v347_v19  ;;  %v351_v22 = vsel %vm350_vm1, %v343_v18, %v345_v20  ;;  %v349_v23 = vpop.permute.xlu1 %348  ;;  %v2158_v18 = vld [vmem:[%s2685_s0 + $0x50] sm:$0xff]  }
  0x8d   : > { %1909 = vmatprep.subr.msk.bf16.mxu0 %vm361_vm2, %v352_v21  ;;  %v363_v24 = vsel %vm361_vm2, %v351_v22, 0  ;;  %v353_v25 = vsel %vm350_vm1, %v347_v19, %v349_v23 }
  0x8e   : > { %386 = vmatpush1.bf16.msra.mxu0 %v363_v24  ;;  %2101 = vmatprep.subr.msk.bf16.mxu1 %vm361_vm2, %v353_v25  ;;  %v369_v26 = vsel %vm361_vm2, %v353_v25, 0  ;;  %v2159_v25 = vld [vmem:[%s2685_s0 + $0x58] sm:$0xff]  }
  0x8f   : > { %2102 = vmatprep.subr.msk.bf16.mxu0 %vm361_vm2, %v2265_v11  ;;  %v616_v29 = vpop.permute.xlu0 %615  ;;  %2048 = vmatpush3.bf16.msra.mxu1 %v369_v26 }
  0x90   : > { %1916 = vmatprep.subr.msk.bf16.mxu1 %vm361_vm2, %v2269_v12  ;;  %v618_v31 = vpop.permute.xlu1 %617  ;;  %v2157_v12 = vld [vmem:[%s2685_s0 + $0x48] sm:$0xff]  }
  0x91   : > { %1910 = vmatmul.mubr.msk.bf16.vlgmr.msra.gmra.mxu0 %vm354_vm0, %v2248_v5  ;;  %v624_v41 = vsel %vm623_vm3, %v616_v29, %v618_v31  ;;  %v2160_v29 = vld [vmem:[%s2685_s0 + $0x60] sm:$0xff]  }
  0x92   : > { %2054 = vmatpush3.bf16.msra.mxu0 %v496_v27  ;;  %413 = vmatprep.mubr.bf16.mxu0 %v2191_v6  ;;  %v634_v45 = vsel %vm361_vm2, %v624_v41, 0 }
  0x93   : > { %2050 = vmatmul.mubr.msk.bf16.vlgmr.msra.gmra.mxu1 %vm354_vm0, %v2149_v28  ;;  %v620_v32 = vpop.permute.xlu0 %619 }
  0x94   : > { %513 = vmatpush1.bf16.msra.mxu1 %v490_v30  ;;  %530 = vmatprep.mubr.bf16.mxu1 %v2191_v6  ;;  %v625_v33 = vsel %vm623_vm3, %v618_v31, %v620_v32  ;;  %v622_v34 = vpop.permute.xlu1 %621 }
  0x95   : > { %1927 = vmatprep.subr.msk.bf16.mxu0 %vm361_vm2, %v625_v33  ;;  %v626_v35 = vsel %vm623_vm3, %v620_v32, %v622_v34  ;;  %v2161_v34 = vld [vmem:[%s2685_s0 + $0x68] sm:$0xff]  }
  0x96   : > { %2103 = vmatprep.subr.msk.bf16.mxu1 %vm361_vm2, %v626_v35  ;;  %v640_v38 = vsel %vm361_vm2, %v626_v35, 0 }
  0x97   : > { %v772_v37 = vpop.permute.xlu0 %771 }
  0x98   : > { %v774_v39 = vpop.permute.xlu1 %773 }
  0x99   : > { %1911 = vmatmul.mubr.msk.bf16.gmra.mxu0 %vm354_vm0, %v2149_v28  ;;  %v780_v51 = vsel %vm779_vm4, %v772_v37, %v774_v39 }
  0x9a   : > { %2055 = vmatprep.mubr.msk.bf16.mxu0 %vm354_vm0, %v2150_v36  ;;  %v790_v56 = vsel %vm361_vm2, %v780_v51, 0 }
  0x9b   : > { %1917 = vmatmul.mubr.msk.bf16.vlgmr.msra.gmra.mxu1 %vm354_vm0, %v2150_v36  ;;  %v776_v40 = vpop.permute.xlu0 %775 }
  0x9c   : > { %540 = vmatprep.mubr.bf16.mxu1 %v2191_v6  ;;  %2060 = vmatpush3.bf16.msra.mxu1 %v640_v38  ;;  %v781_v42 = vsel %vm779_vm4, %v774_v39, %v776_v40  ;;  %v778_v44 = vpop.permute.xlu1 %777  ;;  %v2162_v39 = vld [vmem:[%s2685_s0 + $0x70] sm:$0xff]  }
  0x9d   : > { %1938 = vmatprep.subr.msk.bf16.mxu1 %vm361_vm2, %v781_v42  ;;  %v782_v47 = vsel %vm779_vm4, %v776_v40, %v778_v44  ;;  %v2163_v42 = vld [vmem:[%s2685_s0 + $0x78] sm:$0xff]   ;;  %v2164_v44 = vld [vmem:[%s2685_s0 + $0x80] sm:$0xff]  }
  0x9e   : > { %v796_v52 = vsel %vm361_vm2, %v782_v47, 0 }
  0x9f   : > { %v928_v46 = vpop.permute.xlu0 %927 }
  0xa0   : > { %v930_v49 = vpop.permute.xlu1 %929 }
  0xa1   : > { %2056 = vmatmul.mubr.msk.bf16.vlgmr.msra.gmra.mxu0 %vm354_vm0, %v2151_v43  ;;  %v936_v1 = vsel %vm935_vm5, %v928_v46, %v930_v49 }
  0xa2   : > { %657 = vmatpush1.bf16.msra.mxu0 %v634_v45  ;;  %674 = vmatprep.mubr.bf16.mxu0 %v2191_v6  ;;  %v946_v3 = vsel %vm361_vm2, %v936_v1, 0  ;;  %v2165_v45 = vld [vmem:[%s2685_s0 + $0x88] sm:$0xff]  }
  0xa3   : > { %1918 = vmatmul.mubr.msk.bf16.gmra.mxu1 %vm354_vm0, %v2151_v43  ;;  %2104 = vmatprep.subr.msk.bf16.mxu0 %vm361_vm2, %v782_v47  ;;  %v932_v50 = vpop.permute.xlu0 %931 }
  0xa4   : > { %2061 = vmatprep.mubr.msk.bf16.mxu1 %vm354_vm0, %v2152_v48  ;;  %v934_v54 = vpop.permute.xlu1 %933  ;;  %v937_v55 = vsel %vm935_vm5, %v930_v49, %v932_v50 }
  0xa5   : > { %v938_v58 = vsel %vm935_vm5, %v932_v50, %v934_v54 }
  0xa6   : > { %v952_v62 = vsel %vm361_vm2, %v938_v58, 0 }
  0xa7   : > { %v1084_v57 = vpop.permute.xlu0 %1083 }
  0xa8   : > { %v1086_v61 = vpop.permute.xlu1 %1085 }
  0xa9   : > { %1928 = vmatmul.mubr.msk.bf16.vlgmr.msra.gmra.mxu0 %vm354_vm0, %v2152_v48  ;;  %v1092_v10 = vsel %vm1091_vm6, %v1084_v57, %v1086_v61 }
  0xaa   : > { %2066 = vmatpush3.bf16.msra.mxu0 %v796_v52  ;;  %684 = vmatprep.mubr.bf16.mxu0 %v2191_v6  ;;  %v1102_v15 = vsel %vm361_vm2, %v1092_v10, 0 }
  0xab   : > { %2062 = vmatmul.mubr.msk.bf16.vlgmr.msra.gmra.mxu1 %vm354_vm0, %v2153_v53  ;;  %1949 = vmatprep.subr.msk.bf16.mxu0 %vm361_vm2, %v937_v55  ;;  %v1088_v60 = vpop.permute.xlu0 %1087 }
  0xac   : > { %813 = vmatpush1.bf16.msra.mxu1 %v790_v56  ;;  %830 = vmatprep.mubr.bf16.mxu1 %v2191_v6  ;;  %v1093_v63 = vsel %vm1091_vm6, %v1086_v61, %v1088_v60  ;;  %v1090_v0 = vpop.permute.xlu1 %1089 }
  0xad   : > { %2105 = vmatprep.subr.msk.bf16.mxu1 %vm361_vm2, %v938_v58  ;;  %v1094_v5 = vsel %vm1091_vm6, %v1088_v60, %v1090_v0 }
  0xae   : > { %v1108_v11 = vsel %vm361_vm2, %v1094_v5, 0 }
  0xaf   : > { %v1240_v4 = vpop.permute.xlu0 %1239 }
  0xb0   : > { %v1242_v8 = vpop.permute.xlu1 %1241 }
  0xb1   : > { %1929 = vmatmul.mubr.msk.bf16.gmra.mxu0 %vm354_vm0, %v2153_v53  ;;  %v1248_v24 = vsel %vm1247_vm7, %v1240_v4, %v1242_v8 }
  0xb2   : > { %2067 = vmatprep.mubr.msk.bf16.mxu0 %vm354_vm0, %v2154_v59  ;;  %v1258_v26 = vsel %vm361_vm2, %v1248_v24, 0 }
  0xb3   : > { %1939 = vmatmul.mubr.msk.bf16.vlgmr.msra.gmra.mxu1 %vm354_vm0, %v2154_v59  ;;  %v1244_v9 = vpop.permute.xlu0 %1243 }
  0xb4   : > { %840 = vmatprep.mubr.bf16.mxu1 %v2191_v6  ;;  %2072 = vmatpush3.bf16.msra.mxu1 %v952_v62  ;;  %v1246_v13 = vpop.permute.xlu1 %1245  ;;  %v1249_v14 = vsel %vm1247_vm7, %v1242_v8, %v1244_v9 }
  0xb5   : > { %1960 = vmatprep.subr.msk.bf16.mxu1 %vm361_vm2, %v1093_v63  ;;  %v1250_v17 = vsel %vm1247_vm7, %v1244_v9, %v1246_v13 }
  0xb6   : > { %v1264_v21 = vsel %vm361_vm2, %v1250_v17, 0 }
  0xb7   : > { %v1396_v16 = vpop.permute.xlu0 %1395 }
  0xb8   : > { %v1398_v20 = vpop.permute.xlu1 %1397 }
  0xb9   : > { %2068 = vmatmul.mubr.msk.bf16.vlgmr.msra.gmra.mxu0 %vm354_vm0, %v2155_v2  ;;  %v1404_v32 = vsel %vm1403_vm8, %v1396_v16, %v1398_v20 }
  0xba   : > { %969 = vmatpush1.bf16.msra.mxu0 %v946_v3  ;;  %986 = vmatprep.mubr.bf16.mxu0 %v2191_v6  ;;  %v1414_v37 = vsel %vm361_vm2, %v1404_v32, 0 }
  0xbb   : > { %1940 = vmatmul.mubr.msk.bf16.gmra.mxu1 %vm354_vm0, %v2155_v2  ;;  %2106 = vmatprep.subr.msk.bf16.mxu0 %vm361_vm2, %v1094_v5  ;;  %v1400_v19 = vpop.permute.xlu0 %1399 }
  0xbc   : > { %2073 = vmatprep.mubr.msk.bf16.mxu1 %vm354_vm0, %v2156_v7  ;;  %v1405_v22 = vsel %vm1403_vm8, %v1398_v20, %v1400_v19  ;;  %v1402_v23 = vpop.permute.xlu1 %1401 }
  0xbd   : > { %v1406_v28 = vsel %vm1403_vm8, %v1400_v19, %v1402_v23 }
  0xbe   : > { %v1420_v33 = vsel %vm361_vm2, %v1406_v28, 0 }
  0xbf   : > { %v1552_v27 = vpop.permute.xlu0 %1551 }
  0xc0   : > { %v1554_v30 = vpop.permute.xlu1 %1553 }
  0xc1   : > { %1950 = vmatmul.mubr.msk.bf16.vlgmr.msra.gmra.mxu0 %vm354_vm0, %v2156_v7  ;;  %v1560_v41 = vsel %vm1559_vm9, %v1552_v27, %v1554_v30 }
  0xc2   : > { %2078 = vmatpush3.bf16.msra.mxu0 %v1108_v11  ;;  %996 = vmatprep.mubr.bf16.mxu0 %v2191_v6  ;;  %v1570_v43 = vsel %vm361_vm2, %v1560_v41, 0 }
  0xc3   : > { %2074 = vmatmul.mubr.msk.bf16.vlgmr.msra.gmra.mxu1 %vm354_vm0, %v2157_v12  ;;  %1971 = vmatprep.subr.msk.bf16.mxu0 %vm361_vm2, %v1249_v14  ;;  %v1556_v31 = vpop.permute.xlu0 %1555 }
  0xc4   : > { %1125 = vmatpush1.bf16.msra.mxu1 %v1102_v15  ;;  %1142 = vmatprep.mubr.bf16.mxu1 %v2191_v6  ;;  %v1558_v35 = vpop.permute.xlu1 %1557  ;;  %v1561_v36 = vsel %vm1559_vm9, %v1554_v30, %v1556_v31 }
  0xc5   : > { %2107 = vmatprep.subr.msk.bf16.mxu1 %vm361_vm2, %v1250_v17  ;;  %v1562_v38 = vsel %vm1559_vm9, %v1556_v31, %v1558_v35 }
  0xc6   : > { %v1576_v40 = vsel %vm361_vm2, %v1562_v38, 0 }
  0xc9   : > { %1951 = vmatmul.mubr.msk.bf16.gmra.mxu0 %vm354_vm0, %v2157_v12 }
  0xca   : > { %2079 = vmatprep.mubr.msk.bf16.mxu0 %vm354_vm0, %v2158_v18 }
  0xcb   : > { %1961 = vmatmul.mubr.msk.bf16.vlgmr.msra.gmra.mxu1 %vm354_vm0, %v2158_v18 }
  0xcc   : > { %1152 = vmatprep.mubr.bf16.mxu1 %v2191_v6  ;;  %2084 = vmatpush3.bf16.msra.mxu1 %v1264_v21 }
  0xcd   : > { %1982 = vmatprep.subr.msk.bf16.mxu1 %vm361_vm2, %v1405_v22 }
  0xd1   : > { %2080 = vmatmul.mubr.msk.bf16.vlgmr.msra.gmra.mxu0 %vm354_vm0, %v2159_v25 }
  0xd2   : > { %1281 = vmatpush1.bf16.msra.mxu0 %v1258_v26  ;;  %1298 = vmatprep.mubr.bf16.mxu0 %v2191_v6 }
  0xd3   : > { %1962 = vmatmul.mubr.msk.bf16.gmra.mxu1 %vm354_vm0, %v2159_v25  ;;  %2108 = vmatprep.subr.msk.bf16.mxu0 %vm361_vm2, %v1406_v28 }
  0xd4   : > { %2085 = vmatprep.mubr.msk.bf16.mxu1 %vm354_vm0, %v2160_v29 }
  0xd9   : > { %1972 = vmatmul.mubr.msk.bf16.vlgmr.msra.gmra.mxu0 %vm354_vm0, %v2160_v29 }
  0xda   : > { %2090 = vmatpush3.bf16.msra.mxu0 %v1420_v33  ;;  %1308 = vmatprep.mubr.bf16.mxu0 %v2191_v6 }
  0xdb   : > { %2086 = vmatmul.mubr.msk.bf16.vlgmr.msra.gmra.mxu1 %vm354_vm0, %v2161_v34  ;;  %1993 = vmatprep.subr.msk.bf16.mxu0 %vm361_vm2, %v1561_v36 }
  0xdc   : > { %1437 = vmatpush1.bf16.msra.mxu1 %v1414_v37  ;;  %1454 = vmatprep.mubr.bf16.mxu1 %v2191_v6 }
  0xdd   : > { %2109 = vmatprep.subr.msk.bf16.mxu1 %vm361_vm2, %v1562_v38 }
  0xe1   : > { %1973 = vmatmul.mubr.msk.bf16.gmra.mxu0 %vm354_vm0, %v2161_v34 }
  0xe2   : > { %2091 = vmatprep.mubr.msk.bf16.mxu0 %vm354_vm0, %v2162_v39 }
  0xe3   : > { %1983 = vmatmul.mubr.msk.bf16.vlgmr.msra.gmra.mxu1 %vm354_vm0, %v2162_v39 }
  0xe4   : > { %1464 = vmatprep.mubr.bf16.mxu1 %v2191_v6  ;;  %2096 = vmatpush3.bf16.msra.mxu1 %v1576_v40 }
  0xe9   : > { %2092 = vmatmul.mubr.msk.bf16.vlgmr.msra.gmra.mxu0 %vm354_vm0, %v2163_v42 }
  0xea   : > { %1593 = vmatpush1.bf16.msra.mxu0 %v1570_v43  ;;  %1610 = vmatprep.mubr.bf16.mxu0 %v2191_v6 }
  0xeb   : > { %1984 = vmatmul.mubr.msk.bf16.gmra.mxu1 %vm354_vm0, %v2163_v42 }
  0xec   : > { %2097 = vmatprep.mubr.msk.bf16.mxu1 %vm354_vm0, %v2164_v44 }
  0xf1   : > { %1994 = vmatmul.mubr.msk.bf16.vlgmr.msra.gmra.mxu0 %vm354_vm0, %v2164_v44 }
  0xf2   : > { %1620 = vmatprep.mubr.bf16.mxu0 %v2191_v6 }
  0xf3   : > { %2098 = vmatmul.mubr.msk.bf16.vlgmr.msra.gmra.mxu1 %vm354_vm0, %v2165_v45 }
  0xf9   : > { %1995 = vmatmul.mubr.msk.bf16.gmra.mxu0 %vm354_vm0, %v2165_v45 }
 0x151   : > { %v405_v46 = vpop.f32.mrf.mxu0 }
 0x153   : > { %v407_v47 = vpop.f32.mrf.mxu0  ;;  %v2051_v48 = vpop.f32.mrf.mxu1 }
 0x155   : > { %v409_v49 = vpop.f32.mrf.mxu0  ;;  %v458_v50 = vpop.f32.mrf.mxu1 }
 0x157   : > { %v411_v51 = vpop.f32.mrf.mxu0  ;;  %v2052_v52 = vpop.f32.mrf.mxu1 }
 0x159   : > { %v415_v53 = vpop.f32.mrf.mxu0  ;;  %v461_v54 = vpop.f32.mrf.mxu1 }
 0x15b   : > { %v417_v55 = vpop.f32.mrf.mxu0  ;;  %v532_v56 = vpop.f32.mrf.mxu1 }
 0x15c   : > { %v2471_v57 = vadd.f32 %v532_v56, %v405_v46 }
 0x15d   : > { %v419_v58 = vpop.f32.mrf.mxu0  ;;  %v534_v59 = vpop.f32.mrf.mxu1 }
 0x15e   : > { %v2473_v6 = vadd.f32 %v534_v59, %v407_v47 }
 0x15f   : > { %v421_v60 = vpop.f32.mrf.mxu0  ;;  %v536_v61 = vpop.f32.mrf.mxu1 }
 0x160   : > { %v2475_v62 = vadd.f32 %v536_v61, %v409_v49 }
 0x161   : > { %v538_v63 = vpop.f32.mrf.mxu1  ;;  %v2057_v0 = vpop.f32.mrf.mxu0 }
 0x162   : > { %v2477_v1 = vadd.f32 %v538_v63, %v411_v51  ;;  %v2479_v2 = vadd.f32 %v2057_v0, %v2051_v48 }
 0x163   : > { %v542_v3 = vpop.f32.mrf.mxu1  ;;  %v585_v4 = vpop.f32.mrf.mxu0 }
 0x164   : > { %v2481_v5 = vadd.f32 %v542_v3, %v415_v53  ;;  %v2483_v7 = vadd.f32 %v585_v4, %v458_v50 }
 0x165   : > { %v544_v8 = vpop.f32.mrf.mxu1  ;;  %v2058_v9 = vpop.f32.mrf.mxu0 }
 0x166   : > { %v2485_v10 = vadd.f32 %v544_v8, %v417_v55  ;;  %v2487_v11 = vadd.f32 %v2058_v9, %v2052_v52 }
 0x167   : > { %v546_v12 = vpop.f32.mrf.mxu1  ;;  %v588_v13 = vpop.f32.mrf.mxu0 }
 0x168   : > { %v2489_v14 = vadd.f32 %v546_v12, %v419_v58  ;;  %v2491_v15 = vadd.f32 %v588_v13, %v461_v54 }
 0x169   : > { %v548_v16 = vpop.f32.mrf.mxu1  ;;  %v676_v17 = vpop.f32.mrf.mxu0 }
 0x16a   : > { %v2493_v18 = vadd.f32 %v548_v16, %v421_v60 }
 0x16b   : > { %v678_v19 = vpop.f32.mrf.mxu0  ;;  %v2063_v20 = vpop.f32.mrf.mxu1 }
 0x16d   : > { %v680_v21 = vpop.f32.mrf.mxu0  ;;  %v729_v22 = vpop.f32.mrf.mxu1 }
 0x16f   : > { %v682_v23 = vpop.f32.mrf.mxu0  ;;  %v2064_v24 = vpop.f32.mrf.mxu1 }
 0x171   : > { %v686_v25 = vpop.f32.mrf.mxu0  ;;  %v732_v26 = vpop.f32.mrf.mxu1 }
 0x173   : > { %v688_v27 = vpop.f32.mrf.mxu0  ;;  %v832_v28 = vpop.f32.mrf.mxu1 }
 0x175   : > { %v690_v29 = vpop.f32.mrf.mxu0  ;;  %v834_v30 = vpop.f32.mrf.mxu1 }
 0x177   : > { %v2495_v31 = vpop.f32.mrf.mxu0  ;;  %v2497_v32 = vpop.f32.mrf.mxu1 }
 0x179   : > { %v2499_v33 = vpop.f32.mrf.mxu1  ;;  %v2501_v34 = vpop.f32.mrf.mxu0 }
 0x17b   : > { %v2503_v35 = vpop.f32.mrf.mxu1  ;;  %v2505_v36 = vpop.f32.mrf.mxu0 }
 0x17d   : > { %v2507_v37 = vpop.f32.mrf.mxu1  ;;  %v2509_v38 = vpop.f32.mrf.mxu0 }
 0x17f   : > { %v2511_v39 = vpop.f32.mrf.mxu1  ;;  %v2513_v40 = vpop.f32.mrf.mxu0 }
 0x181   : > { %v2515_v41 = vpop.f32.mrf.mxu1  ;;  %v2517_v42 = vpop.f32.mrf.mxu0 }
 0x183   : > { %v2519_v43 = vpop.f32.mrf.mxu0  ;;  %v2521_v44 = vpop.f32.mrf.mxu1 }
 0x185   : > { %v2523_v45 = vpop.f32.mrf.mxu0  ;;  %v2525_v46 = vpop.f32.mrf.mxu1 }
 0x187   : > { %v2527_v47 = vpop.f32.mrf.mxu0  ;;  %v2529_v48 = vpop.f32.mrf.mxu1 }
 0x189   : > { %v2531_v49 = vpop.f32.mrf.mxu0  ;;  %v2533_v50 = vpop.f32.mrf.mxu1 }
 0x18b   : > { %v2535_v51 = vpop.f32.mrf.mxu0  ;;  %v2537_v52 = vpop.f32.mrf.mxu1 }
 0x18d   : > { %v2539_v53 = vpop.f32.mrf.mxu0  ;;  %v2541_v54 = vpop.f32.mrf.mxu1 }
 0x18f   : > { %v2543_v55 = vpop.f32.mrf.mxu0  ;;  %v2545_v56 = vpop.f32.mrf.mxu1 }
 0x191   : > { %v2547_v58 = vpop.f32.mrf.mxu1  ;;  %v2549_v59 = vpop.f32.mrf.mxu0 }
 0x192   : > { %2690 = vst [vmem:[#allocation2_spill] sm:$0xff] %v2547_v58  ;;  %v744_v58 = vadd.f32 %v676_v17, %v2471_v57  ;;  %v749_v57 = vadd.f32 %v732_v26, %v2491_v15 }
 0x193   : > { %v2551_v60 = vpop.f32.mrf.mxu1  ;;  %v2553_v61 = vpop.f32.mrf.mxu0 }
 0x194   : > { %2691 = vst [vmem:[#allocation3_spill] sm:$0xff] %v2551_v60  ;;  %2692 = vst [vmem:[#allocation4_spill] sm:$0xff] %v2553_v61  ;;  %v900_v17 = vadd.f32 %v832_v28, %v744_v58 }
 0x195   : > { %v2555_v63 = vpop.f32.mrf.mxu1  ;;  %v2557_v0 = vpop.f32.mrf.mxu0 }
 0x196   : > { %2693 = vst [vmem:[#allocation5_spill] sm:$0xff] %v2555_v63  ;;  %2694 = vst [vmem:[#allocation6_spill] sm:$0xff] %v2557_v0  ;;  %v1056_v26 = vadd.f32 %v2517_v42, %v900_v17 }
 0x197   : > { %v2559_v3 = vpop.f32.mrf.mxu1  ;;  %v2561_v4 = vpop.f32.mrf.mxu0 }
 0x198   : > { %2695 = vst [vmem:[#allocation7_spill] sm:$0xff] %v2559_v3  ;;  %2696 = vst [vmem:[#allocation8_spill] sm:$0xff] %v2561_v4 }
 0x199   : > { %v2563_v8 = vpop.f32.mrf.mxu1  ;;  %v1300_v9 = vpop.f32.mrf.mxu0 }
 0x19a   : > { %2697 = vst [vmem:[#allocation9_spill] sm:$0xff] %v2563_v8 }
 0x19b   : > { %v2565_v12 = vpop.f32.mrf.mxu0  ;;  %v2567_v13 = vpop.f32.mrf.mxu1 }
 0x19c   : > { %2698 = vst [vmem:[#allocation10_spill] sm:$0xff] %v2565_v12  ;;  %2699 = vst [vmem:[#allocation11_spill] sm:$0xff] %v2567_v13  ;;  %v745_v12 = vadd.f32 %v678_v19, %v2473_v6  ;;  %v752_v13 = vadd.f32 %v2063_v20, %v2479_v2  ;;  %v751_v6 = vadd.f32 %v688_v27, %v2485_v10 }
 0x19d   : > { %v2569_v16 = vpop.f32.mrf.mxu0  ;;  %v2571_v60 = vpop.f32.mrf.mxu1  ;;  %v753_v2 = vadd.f32 %v690_v29, %v2489_v14  ;;  %v754_v20 = vadd.f32 %v2495_v31, %v2493_v18  ;;  %v905_v18 = vadd.f32 %v2513_v40, %v749_v57 }
 0x19e   : > { %2700 = vst [vmem:[#allocation12_spill] sm:$0xff] %v2569_v16  ;;  %2701 = vst [vmem:[#allocation13_spill] sm:$0xff] %v2571_v60  ;;  %v747_v16 = vadd.f32 %v680_v21, %v2475_v62  ;;  %v746_v60 = vadd.f32 %v729_v22, %v2483_v7  ;;  %v901_v62 = vadd.f32 %v834_v30, %v745_v12  ;;  %v1699_v57 = vpop.permute.xlu0 %1698 }
 0x19f   : > { %v2573_v61 = vpop.f32.mrf.mxu0  ;;  %v2575_v63 = vpop.f32.mrf.mxu1  ;;  %v907_v14 = vadd.f32 %v2507_v37, %v751_v6  ;;  %v2715_v6 = vld [vmem:[#allocation8_spill] sm:$0xff] }
 0x1a0   : > { %2702 = vst [vmem:[#allocation14_spill] sm:$0xff] %v2573_v61  ;;  %2703 = vst [vmem:[#allocation15_spill] sm:$0xff] %v2575_v63  ;;  %v902_v10 = vadd.f32 %v2505_v36, %v746_v60  ;;  %v1057_v27 = vadd.f32 %v2519_v43, %v901_v62  ;;  %v1212_v36 = vadd.f32 %v2537_v52, %v1056_v26  ;;  %v2625_v37 = vpop.permute.xlu1 %1703  ;;  %v2708_v52 = vld [vmem:[#allocation3_spill] sm:$0xff] }
 0x1a1   : > { %v2577_v0 = vpop.f32.mrf.mxu0  ;;  %v2579_v3 = vpop.f32.mrf.mxu1 }
 0x1a2   : > { %2704 = vst [vmem:[#allocation16_spill] sm:$0xff] %v2577_v0  ;;  %2705 = vst [vmem:[#allocation17_spill] sm:$0xff] %v2579_v3  ;;  %v748_v0 = vadd.f32 %v682_v23, %v2477_v1  ;;  %v755_v3 = vadd.f32 %v2064_v24, %v2487_v11  ;;  %v903_v1 = vadd.f32 %v2497_v32, %v747_v16 }
 0x1a3   : > { %v2581_v4 = vpop.f32.mrf.mxu0  ;;  %v1456_v8 = vpop.f32.mrf.mxu1  ;;  %v909_v24 = vadd.f32 %v2511_v39, %v753_v2  ;;  %v1058_v30 = vadd.f32 %v2525_v46, %v902_v10  ;;  %v1063_v39 = vadd.f32 %v2535_v51, %v907_v14  ;;  %v2710_v51 = vld [vmem:[#allocation5_spill] sm:$0xff]  ;;  %v2712_v12 = vld [vmem:[#allocation10_spill] sm:$0xff] }
 0x1a4   : > { %2706 = vst [vmem:[#allocation18_spill] sm:$0xff] %v2581_v4  ;;  %v750_v4 = vadd.f32 %v686_v25, %v2481_v5  ;;  %v904_v11 = vadd.f32 %v2499_v33, %v748_v0  ;;  %v908_v5 = vadd.f32 %v2501_v34, %v752_v13  ;;  %v911_v21 = vadd.f32 %v2509_v38, %v755_v3  ;;  %v2716_v2 = vld [vmem:[#allocation9_spill] sm:$0xff] }
 0x1a5   : > { %v2588_v61 = vpop.f32.mrf.mxu0  ;;  %v2590_v63 = vpop.f32.mrf.mxu1  ;;  %v910_v25 = vadd.f32 %v2515_v41, %v754_v20  ;;  %v1059_v29 = vadd.f32 %v2523_v45, %v903_v1  ;;  %v1061_v38 = vadd.f32 %v2533_v50, %v905_v18  ;;  %v1065_v40 = vadd.f32 %v2539_v53, %v909_v24  ;;  %v2709_v50 = vld [vmem:[#allocation4_spill] sm:$0xff] }
 0x1a6   : > { %v906_v15 = vadd.f32 %v2503_v35, %v750_v4  ;;  %v1064_v28 = vadd.f32 %v2521_v44, %v908_v5  ;;  %v1060_v33 = vadd.f32 %v2527_v47, %v904_v11  ;;  %v1067_v34 = vadd.f32 %v2529_v48, %v911_v21  ;;  %v2707_v48 = vld [vmem:[#allocation2_spill] sm:$0xff]  ;;  %v2717_v20 = vld [vmem:[#allocation12_spill] sm:$0xff] }
 0x1a7   : > { %v2598_v19 = vpop.f32.mrf.mxu0  ;;  %v2600_v7 = vpop.f32.mrf.mxu1  ;;  %v1213_v41 = vadd.f32 %v2541_v54, %v1057_v27  ;;  %v1066_v44 = vadd.f32 %v2543_v55, %v910_v25  ;;  %v1215_v45 = vadd.f32 %v2545_v56, %v1059_v29  ;;  %v1368_v47 = vadd.f32 %v1300_v9, %v1212_v36  ;;  %v2711_v54 = vld [vmem:[#allocation6_spill] sm:$0xff]  ;;  %v2713_v55 = vld [vmem:[#allocation11_spill] sm:$0xff] }
 0x1a8   : > { %v1062_v35 = vadd.f32 %v2531_v49, %v906_v15  ;;  %v1220_v46 = vadd.f32 %v2549_v59, %v1064_v28  ;;  %v1216_v49 = vadd.f32 %v2707_v48, %v1060_v33  ;;  %v1214_v60 = vadd.f32 %v2709_v50, %v1058_v30  ;;  %v2714_v59 = vld [vmem:[#allocation7_spill] sm:$0xff]  ;;  %v2718_v15 = vld [vmem:[#allocation13_spill] sm:$0xff]  ;;  %v2719_v18 = vld [vmem:[#allocation14_spill] sm:$0xff] }
 0x1a9   : > { %v2611_v22 = vpop.f32.mrf.mxu1  ;;  %v2093_v23 = vpop.f32.mrf.mxu0  ;;  %v1219_v0 = vadd.f32 %v2710_v51, %v1063_v39  ;;  %v1223_v4 = vadd.f32 %v2711_v54, %v1067_v34  ;;  %v1369_v13 = vadd.f32 %v2712_v12, %v1213_v41  ;;  %v1524_v56 = vadd.f32 %v1456_v8, %v1368_v47  ;;  %v2720_v26 = vld [vmem:[#allocation15_spill] sm:$0xff]  ;;  %v2721_v28 = vld [vmem:[#allocation16_spill] sm:$0xff]  ;;  %v2722_v30 = vld [vmem:[#allocation17_spill] sm:$0xff] }
 0x1aa   : > { %v1218_v58 = vadd.f32 %v2708_v52, %v1062_v35  ;;  %v1376_v16 = vadd.f32 %v2713_v55, %v1220_v46  ;;  %v1221_v9 = vadd.f32 %v2714_v59, %v1065_v40  ;;  %v1217_v17 = vadd.f32 %v2715_v6, %v1061_v38  ;;  %v1709_v8 = vpop.permute.xlu1 %1708 }
 0x1ab   : > { %v1466_v31 = vpop.f32.mrf.mxu1  ;;  %v1509_v32 = vpop.f32.mrf.mxu0  ;;  %v1222_v62 = vadd.f32 %v2716_v2, %v1066_v44  ;;  %v1371_v1 = vadd.f32 %v2717_v20, %v1215_v45  ;;  %v1370_v10 = vadd.f32 %v2718_v15, %v1214_v60  ;;  %v1525_v14 = vadd.f32 %v2590_v63, %v1369_v13  ;;  %v2723_v41 = vld [vmem:[#allocation18_spill] sm:$0xff] }
 0x1ac   : > { %v1532_v21 = vadd.f32 %v2093_v23, %v1376_v16  ;;  %v1372_v25 = vadd.f32 %v2719_v18, %v1216_v49  ;;  %v1379_v27 = vadd.f32 %v2720_v26, %v1223_v4  ;;  %v1374_v29 = vadd.f32 %v2721_v28, %v1218_v58  ;;  %v1714_v13 = vpop.permute.xlu0 %1713 }
 0x1ad   : > { %v1468_v42 = vpop.f32.mrf.mxu1  ;;  %v2094_v43 = vpop.f32.mrf.mxu0  ;;  %v1373_v33 = vadd.f32 %v2722_v30, %v1217_v17  ;;  %v1526_v36 = vadd.f32 %v1509_v32, %v1370_v10  ;;  %v1375_v63 = vadd.f32 %v2723_v41, %v1219_v0  ;;  %v1377_v23 = vadd.f32 %v2588_v61, %v1221_v9 }
 0x1ae   : > { %v1378_v44 = vadd.f32 %v2598_v19, %v1222_v62  ;;  %v1527_v45 = vadd.f32 %v2600_v7, %v1371_v1  ;;  %v1528_v48 = vadd.f32 %v2611_v22, %v1372_v25  ;;  %v1530_v32 = vadd.f32 %v1466_v31, %v1374_v29 }
 0x1af   : > { %v1470_v53 = vpop.f32.mrf.mxu1  ;;  %v1512_v3 = vpop.f32.mrf.mxu0  ;;  %v1535_v50 = vadd.f32 %v2094_v43, %v1379_v27  ;;  %v1531_v7 = vadd.f32 %v1468_v42, %v1375_v63 }
 0x1b0   : > { %v1529_v55 = vadd.f32 %v1512_v3, %v1373_v33  ;;  %v1533_v6 = vadd.f32 %v1470_v53, %v1377_v23 }
 0x1b1   : > { %v2645_v11 = vpop.f32.mrf.mxu1  ;;  %v1612_v5 = vpop.f32.mrf.mxu0 }
 0x1b2   : > { %v1680_v24 = vadd.f32 %v1612_v5, %v1524_v56  ;;  %v1534_v53 = vadd.f32 %v2645_v11, %v1378_v44 }
 0x1b3   : > { %v1614_v34 = vpop.f32.mrf.mxu0  ;;  %v2099_v35 = vpop.f32.mrf.mxu1 }
 0x1b4   : > { %v1716_v38 = vadd.f32 %v1699_v57, %v1680_v24  ;;  %v1681_v39 = vadd.f32 %v1614_v34, %v1525_v14  ;;  %v1688_v40 = vadd.f32 %v2099_v35, %v1532_v21 }
 0x1b5   : > { %v1665_v46 = vpop.f32.mrf.mxu1  ;;  %v1616_v47 = vpop.f32.mrf.mxu0 }
 0x1b6   : > { %v1717_v49 = vadd.f32 %v1699_v57, %v1681_v39  ;;  %v1682_v52 = vadd.f32 %v1665_v46, %v1526_v36  ;;  %v1724_v58 = vadd.f32 %v1709_v8, %v1688_v40  ;;  %v1728_v60 = vmax.f32 %v1716_v38, 0.0 }
 0x1b7   : > { %v1683_v51 = vadd.f32 %v1616_v47, %v1527_v45  ;;  %v1618_v54 = vpop.f32.mrf.mxu0  ;;  %v2100_v0 = vpop.f32.mrf.mxu1 }
 0x1b8   : > { %v1729_v4 = vmax.f32 %v1717_v49, 0.0  ;;  %v1718_v61 = vadd.f32 %v1699_v57, %v1682_v52  ;;  %v1736_v12 = vmax.f32 %v1724_v58, 0.0  ;;  %v1684_v19 = vadd.f32 %v1618_v54, %v1528_v48 }
 0x1b9   : > { %v1719_v22 = vadd.f32 %v2625_v37, %v1683_v51  ;;  %v1691_v31 = vadd.f32 %v2100_v0, %v1535_v50  ;;  %v1622_v43 = vpop.f32.mrf.mxu0  ;;  %v1668_v16 = vpop.f32.mrf.mxu1 }
 0x1ba   : > { %v2011_v56 = vpack.c.bf16 %v1729_v4, %v1728_v60  ;;  %v1730_v59 = vmax.f32 %v1718_v61, 0.0  ;;  %v2016_v57 = vpack.c.bf16 %v1736_v12, %v1736_v12  ;;  %v1720_v9 = vadd.f32 %v2625_v37, %v1684_v19 }
 0x1bb   : > { %v1727_v42 = vadd.f32 %v1714_v13, %v1691_v31  ;;  %v1686_v3 = vadd.f32 %v1622_v43, %v1530_v32  ;;  %v1685_v17 = vadd.f32 %v1668_v16, %v1529_v55  ;;  %v1624_v2 = vpop.f32.mrf.mxu0  ;;  %v1731_v20 = vmax.f32 %v1719_v22, 0.0 }
 0x1bc   : > { %1780 = vst [vmem:[%s2662_s11] sm:$0xff] %v2011_v56  ;;  %v2012_v62 = vpack.c.bf16 %v1730_v59, %v1730_v59  ;;  %1785 = vst [vmem:[%s2662_s11 + $0x20] sm:$0xf] %v2016_v57  ;;  %v1732_v1 = vmax.f32 %v1720_v9, 0.0  ;;  %v1687_v5 = vadd.f32 %v1624_v2, %v1531_v7 }
 0x1bd   : > { %v1739_v15 = vmax.f32 %v1727_v42, 0.0  ;;  %v1722_v10 = vadd.f32 %v1709_v8, %v1686_v3  ;;  %v1721_v14 = vadd.f32 %v2625_v37, %v1685_v17  ;;  %v1626_v21 = vpop.f32.mrf.mxu0 }
 0x1be   : > { %1781 = vst [vmem:[%s2662_s11 + $0x8] sm:$0xf] %v2012_v62  ;;  %v2013_v24 = vpack.c.bf16 %v1732_v1, %v1731_v20  ;;  %v1723_v18 = vadd.f32 %v1709_v8, %v1687_v5  ;;  %v1689_v25 = vadd.f32 %v1626_v21, %v1533_v6 }
 0x1bf   : > { %v2018_v26 = vpack.c.bf16 %v1739_v15, %v1739_v15  ;;  %v1733_v27 = vmax.f32 %v1721_v14, 0.0  ;;  %v1628_v28 = vpop.f32.mrf.mxu0  ;;  %v1734_v29 = vmax.f32 %v1722_v10, 0.0 }
 0x1c0   : > { %1782 = vst [vmem:[%s2662_s11 + $0xc] sm:$0xff] %v2013_v24  ;;  %v1735_v30 = vmax.f32 %v1723_v18, 0.0  ;;  %v1725_v33 = vadd.f32 %v1714_v13, %v1689_v25  ;;  %v1690_v34 = vadd.f32 %v1628_v28, %v1534_v53 }
 0x1c1   : > { %1787 = vst [vmem:[%s2662_s11 + $0x2c] sm:$0xf] %v2018_v26  ;;  %v2014_v37 = vpack.c.bf16 %v1733_v27, %v1733_v27 }
 0x1c2   : > { %v2015_v35 = vpack.c.bf16 %v1735_v30, %v1734_v29  ;;  %v1726_v36 = vadd.f32 %v1714_v13, %v1690_v34  ;;  %v1737_v11 = vmax.f32 %v1725_v33, 0.0 }
 0x1c3   : > { %1783 = vst [vmem:[%s2662_s11 + $0x14] sm:$0xf] %v2014_v37 }
 0x1c4   : > { %1784 = vst [vmem:[%s2662_s11 + $0x18] sm:$0xff] %v2015_v35  ;;  %v1738_v38 = vmax.f32 %v1726_v36, 0.0 }
 0x1c6   : > { %v2017_v39 = vpack.c.bf16 %v1738_v38, %v1737_v11 }
 0x1c8   : > { %1786 = vst [vmem:[%s2662_s11 + $0x24] sm:$0xff] %v2017_v39 }
 0x1c9 PF: > { %s14_s17 = sadd.s32 1, %s2188_s17   ;;  %s2724_s15 = smov %s2184_s16 }
 0x1ca   : > { %p11_p5 = scmp.ge.s32.totalorder %s14_s17, 4   ;;  %s2725_s16 = smov %s2727_s18 }
 0x1cc   :  { %13 = sbr.rel (!%p11_p5) target bundleno = 2 (0x2), region = 77 }

</bundles_post_ra>
